<compile_context>
chip_gen: v7x
topology: tpu7x:2x2x1
jax: 0.10.0
libtpu: 0.0.40
codegen_flags: <defaults>
</compile_context>

<pallas_src>
import jax
import jax.numpy as jnp
from jax.experimental import pallas as pl
from jax.experimental.pallas import tpu as pltpu


def heuristic_actor_kernel(scale_ref, src_ref, out_ref):
    # scale_ref: [1, LANES]       fused constant (bias * lan_dist_vec * hs_actor_temp)
    # src_ref:   [TILE_R, LANES]  hot activation tile
    # out_ref:   [TILE_R, LANES]
    # Single VPU multiply with a [1, LANES] broadcast over the tile rows.
    out_ref[...] = src_ref[...] * scale_ref[...]


def _round_up(x, m):
    return (x + m - 1) // m * m


# ~2 MiB per block: measured tiled f32 streaming reaches ~85% of HBM roofline
# at 1 MiB-class tiles and larger; 4 double-buffers of 2 MiB (= 8 MiB) fit the
# scoped VMEM default on every generation (v5e 16 MiB, v6e/v7x 32 MiB), so no
# vmem_limit_bytes override is needed.
_TARGET_BLOCK_BYTES = 2 << 20


def _pick_tile_rows(rows, row_bytes):
    t = _TARGET_BLOCK_BYTES // row_bytes
    t = max(8, (t // 8) * 8)            # sublane-aligned row count
    t = min(t, _round_up(rows, 8))      # never bigger than the (padded) row count
    return t


def heuristic_actor_forward(bias_weight, existed_src, lan_dist_scaled,
                            *, force_pallas=False, min_bytes_for_pallas=4 << 20):
    """bias_weight: [1, L], existed_src: [B, L], lan_dist_scaled: [1, L] (already * hs_actor_temp)."""
    B, L = existed_src.shape
    out_dtype = jnp.result_type(bias_weight.dtype, existed_src.dtype, lan_dist_scaled.dtype)
    itemsize = jnp.dtype(out_dtype).itemsize

    # Fold the two parameter vectors into one [1, L] row outside the kernel.
    scale = (bias_weight.reshape(1, L) * lan_dist_scaled.reshape(1, L)).astype(out_dtype)

    # Below a few MiB of traffic, XLA's fused elementwise multiply already hits
    # the roofline with zero launch overhead -> skip the pallas_call.
    if not force_pallas and B * L * itemsize < min_bytes_for_pallas:
        return existed_src.astype(out_dtype) * scale

    src = existed_src.astype(out_dtype)

    # ---- lane-dense repack (biggest single lever for small L) ----------------
    repack = (128 % L == 0)
    if repack:
        pack = 128 // L                     # logical rows per 128-lane row
        b_pad = _round_up(B, pack)
        if b_pad != B:
            src = jnp.pad(src, ((0, b_pad - B), (0, 0)))
        rows = (b_pad * L) // 128
        lanes = 128
        src2 = src.reshape(rows, lanes)     # row-major flatten -> lane-dense
        scale2 = jnp.tile(scale, (1, pack)) # [1, 128]
    else:
        # Fallback layout: keep [B, L]; last block dim equals the full array dim
        # so the (8,128) rule is satisfied, but stores may be masked if L%128!=0.
        b_pad = B
        rows, lanes = B, L
        src2 = src
        scale2 = scale

    tile_r = _pick_tile_rows(rows, lanes * itemsize)
    grid = (pl.cdiv(rows, tile_r),)         # Pallas masks the ragged last block

    out2 = pl.pallas_call(
        heuristic_actor_kernel,
        out_shape=jax.ShapeDtypeStruct((rows, lanes), out_dtype),
        grid=grid,
        in_specs=[
            # Constant block index -> the tiny scale row is not re-DMA'd per step.
            pl.BlockSpec((1, lanes), lambda i: (0, 0)),
            # Hot stream, tiled over (packed) rows.
            pl.BlockSpec((tile_r, lanes), lambda i: (i, 0)),
        ],
        out_specs=pl.BlockSpec((tile_r, lanes), lambda i: (i, 0)),
        compiler_params=pltpu.CompilerParams(
            # Row tiles are independent. TODO(synk): sweep pltpu.CORE_PARALLEL
            # on v7x (2 TCs); the plain string has near-zero codegen impact.
            dimension_semantics=("parallel",),
        ),
        # Pure-bandwidth kernel hint for XLA's scheduler.
        cost_estimate=pl.CostEstimate(
            flops=rows * lanes,
            transcendentals=0,
            bytes_accessed=2 * rows * lanes * itemsize + lanes * itemsize,
        ),
    )(scale2, src2)

    if repack:
        return out2.reshape(b_pad, L)[:B]
    return out2


class HParams:
    # Synthetic deterministic hparams mirroring the PyTorch module's __init__.
    d_hidden = 32
    lan_size = 8
    hs_actor_temp = 2.0
    bias = 0.5
    cuda = False


if __name__ == "__main__":
    hparams = HParams()
    B = 2
    L = hparams.lan_size

    key = jax.random.PRNGKey(0)
    k_lan, k_src = jax.random.split(key)

    # lan_dist_vec (external input to __init__), scaled by hs_actor_temp as in
    # the module: Variable(FloatTensor(lan_dist_vec) * hs_actor_temp)
    lan_dist_vec = jax.random.uniform(k_lan, (L,), dtype=jnp.float32)
    lan_dist_scaled = (lan_dist_vec * hparams.hs_actor_temp).reshape(1, L)

    # bias.weight = Parameter([[bias] * lan_size])  -> shape [1, lan_size]
    bias_weight = jnp.full((1, L), hparams.bias, dtype=jnp.float32)

    # forward input: feature = (feature, existed_src); only existed_src is used.
    existed_src = jax.random.uniform(k_src, (B, L), dtype=jnp.float32)

    # Force the Pallas path so the kernel (lane-dense repack branch) is
    # exercised even at this tiny shape.
    out = heuristic_actor_forward(bias_weight, existed_src, lan_dist_scaled,
                                  force_pallas=True)
    out = jax.block_until_ready(out)

    # Pure-JAX reference check of the broadcasted elementwise product.
    ref = bias_weight * existed_src * lan_dist_scaled
    assert out.shape == (B, L)
    assert out.dtype == ref.dtype
    assert jnp.allclose(out, ref, atol=1e-6), "mismatch vs reference"

    print("KERNEL_OK")
</pallas_src>

<mosaic_0001>
module attributes {stable_mosaic.version = 11 : i64} {
  func.func @heuristic_actor_kernel(%arg0: i32, %arg1: memref<1x128xf32, #tpu.memory_space<vmem>>, %arg2: memref<8x128xf32, #tpu.memory_space<vmem>>, %arg3: memref<8x128xf32, #tpu.memory_space<vmem>>) attributes {dimension_semantics = [#tpu.dimension_semantics<parallel>], iteration_bounds = array<i64: 1>, scalar_prefetch = 0 : i64, scratch_operands = 0 : i64, tpu.core_type = #tpu.core_type<tc>, window_params = [{pipeline_mode = #tpu.pipeline_mode<synchronous>, transform_indices = @transform_0, window_bounds = array<i64: 1, 128>}, {transform_indices = @transform_1, window_bounds = array<i64: 8, 128>}, {transform_indices = @transform_2, window_bounds = array<i64: 8, 128>}]} {
    %c0 = arith.constant 0 : index
    %c0_0 = arith.constant 0 : index
    %0 = vector.load %arg2[%c0, %c0_0] : memref<8x128xf32, #tpu.memory_space<vmem>>, vector<8x128xf32>
    %c0_1 = arith.constant 0 : index
    %c0_2 = arith.constant 0 : index
    %1 = vector.load %arg1[%c0_1, %c0_2] : memref<1x128xf32, #tpu.memory_space<vmem>>, vector<1x128xf32>
    %2 = vector.broadcast %1 : vector<1x128xf32> to vector<8x128xf32>
    %3 = arith.mulf %0, %2 : vector<8x128xf32>
    %c0_3 = arith.constant 0 : index
    %c0_4 = arith.constant 0 : index
    %4 = vector.load %arg3[%c0_3, %c0_4] : memref<8x128xf32, #tpu.memory_space<vmem>>, vector<8x128xf32>
    tpu.vector_store %arg3[%c0_3, %c0_4], %3 {strides = array<i32>} : memref<8x128xf32, #tpu.memory_space<vmem>>, vector<8x128xf32>,
    return
  }
  func.func @transform_0(%arg0: i32) -> (i32, i32) {
    %c0_i32 = arith.constant 0 : i32
    %c0_i32_0 = arith.constant 0 : i32
    %c0_i32_1 = arith.constant 0 : i32
    return %c0_i32, %c0_i32_0 : i32, i32
  }
  func.func @transform_1(%arg0: i32) -> (i32, i32) {
    %c0_i32 = arith.constant 0 : i32
    %c0_i32_0 = arith.constant 0 : i32
    return %arg0, %c0_i32 : i32, i32
  }
  func.func @transform_2(%arg0: i32) -> (i32, i32) {
    %c0_i32 = arith.constant 0 : i32
    %c0_i32_0 = arith.constant 0 : i32
    return %arg0, %c0_i32 : i32, i32
  }
}

</mosaic_0001>

<bundles_post_ra>
// kernel: tpu_custom_call.1
= control target key start
LH: loop header
LB: loop body
LE: loop exit
PB: predicated region body
PF: predicated region fallthrough
CT: control target
= control target key end

     0   :  { %7 = vsyncpa [#allocation3], 0  ;;  %s150_s0 = inlined_call_operand.hbm [shape: f32[1,128], index: 0, kind: input, shape index: {}]   ;;  %s151_s1 = inlined_call_operand.vmem [shape: f32[1,128], index: 1, kind: input, shape index: {}]   ;;  %s152_s2 = inlined_call_operand.hbm [shape: f32[1,128], index: 2, kind: output, shape index: {}]  }
   0x1   :  { %8 = vsyncpa [#allocation4], 0  ;;  %s104_s9 = smov [#allocation2]   ;;  %s56_s13 = scalar_lea.hbm %s150_s0, 16 }
   0x2   :  { %s15_s10 = sshll.u32 %s104_s9, 4  ;;  %p57_p0 = scmp.ne.s32.totalorder %s150_s0, %s56_s13  ;;  %s16_s10 = int_to_ptr.vmem [resolvable:$true] %s15_s10 }
   0x3   :  { %p60_p1 = scmp.lt.u32.totalorder %s56_s13, %s150_s0 }
   0x5   :  { %p62_p2 = pnand %p60_p1, %p57_p0 }
   0x7   :  { %65 = shalt.err (!%p62_p2)
}
   0x8   :  { %s66_s18 = scalar_lea.vmem %s16_s10, 16  ;;  %s70_s19 = scalar_lea.vmem %s16_s10, 32 }
   0x9   :  { %p67_p3 = scmp.ne.s32.totalorder %s16_s10, %s66_s18  ;;  %p71_p4 = scmp.lt.s32.totalorder %s16_s10, %s16_s10 }
   0xa   :  { %p72_p5 = scmp.lt.s32.totalorder %s70_s19, %s66_s18 }
   0xc   :  { %p73_p6 = por %p72_p5, %p71_p4 }
   0xe   :  { %p74_p7 = pnand %p73_p6, %p67_p3 }
  0x10   :  { %77 = shalt.err (!%p74_p7)
}
  0x11   :  { %18 = dma.hbm_to_vmem [thread:$0]  %s150_s0, 16, %s16_s10, [#allocation3]  }
  0x12   :  { %100 = dma.done.wait [#allocation3], 16  }
  0x13   :  { %101 = vsyncadd [#allocation3], 4294967280  ;;  %v24_v0 = vld [vmem:[%s151_s1] sm:$0xff] }
  0x14   :  { %v51_v1 = vld [vmem:[#allocation2] ss:$0 sm:$0xff] }
  0x15   :  { %v32_v2 = vmul.f32 %v51_v1, %v24_v0 }
  0x17   :  { %33 = vst [vmem:[#allocation5] sm:$0xff] %v32_v2 }
  0x18   :  { %38 = vsyncadd [#allocation4], 112  ;;  %s105_s24 = smov [#allocation5]  }
  0x19   :  { %s39_s25 = sshll.u32 %s105_s24, 4  ;;  %s40_s25 = int_to_ptr.vmem [resolvable:$true] %s39_s25 }
  0x1a   :  { %s78_s26 = scalar_lea.vmem %s40_s25, 16  ;;  %s82_s27 = scalar_lea.vmem %s40_s25, 128 }
  0x1b   :  { %p79_p8 = scmp.ne.s32.totalorder %s40_s25, %s78_s26  ;;  %p83_p9 = scmp.lt.s32.totalorder %s40_s25, %s40_s25 }
  0x1c   :  { %p84_p10 = scmp.lt.s32.totalorder %s82_s27, %s78_s26 }
  0x1e   :  { %p85_p11 = por %p84_p10, %p83_p9 }
  0x20   :  { %p86_p12 = pnand %p85_p11, %p79_p8 }
  0x22   :  { %89 = shalt.err (!%p86_p12)
}
  0x23   :  { %s90_s29 = scalar_lea.hbm %s152_s2, 16 }
  0x24   :  { %p91_p13 = scmp.ne.s32.totalorder %s152_s2, %s90_s29  ;;  %p94_p0 = scmp.lt.u32.totalorder %s90_s29, %s152_s2 }
  0x26   :  { %p96_p1 = pnand %p94_p0, %p91_p13 }
  0x28   :  { %99 = shalt.err (!%p96_p1)
}
  0x29   :  { %s106_s5 = smov 16   ;;  %s107_s6 = smov 1  }
  0x2a   :  { %45 = dma.vmem_to_hbm [thread:$0]  %s40_s25, 16, %s152_s2, [#allocation4], %s106_s5, %s106_s5, %s107_s6  }
  0x2b   :  { %102 = dma.done.wait [#allocation4], 128  }
  0x2c   :  { %103 = vsyncadd [#allocation4], 4294967168 }
  0x2d   :  { %49 = vsyncpa [#allocation3], 1 }
  0x2e   :  { %50 = vsyncpa [#allocation4], 1 }

</bundles_post_ra>
